<compile_context>
chip_gen: v5e
topology: v5e:2x2
jax: 0.10.0
libtpu: 0.0.40
codegen_flags: <defaults>
</compile_context>

<pallas_src>
import jax
import jax.numpy as jnp
from jax.experimental import pallas as pl
from jax.experimental.pallas import tpu as pltpu

_LANE = 128
_SUBLANE = 8
_NEG_INF = -1e30  # masks padded class columns out of the log-softmax


def _round_up(x, m):
    return ((x + m - 1) // m) * m


def _classifier_kernel(x_ref, w_ref, b_ref, o_ref):
    # x_ref: (TB, K), w_ref: (K, 128), b_ref: (1, 128), o_ref: (TB, 128)
    logits = jnp.dot(x_ref[...], w_ref[...], preferred_element_type=jnp.float32)
    logits = logits + b_ref[...]  # pad columns carry -1e30 via the bias

    # numerically stable log-softmax over the (padded) class axis
    m = jnp.max(logits, axis=-1, keepdims=True)              # pad cols never win the max
    z = logits - m
    lse = jnp.log(jnp.sum(jnp.exp(z), axis=-1, keepdims=True))  # exp(pad) underflows to 0
    o_ref[...] = z - lse


def dummy_classifier_forward(x_nchw, weight, bias, *, block_b=2048):
    """x_nchw: (B, 1, 28, 28) f32; weight: (10, 784) f32 (PyTorch layout); bias: (10,) f32."""
    B = x_nchw.shape[0]
    num_classes, in_features = weight.shape
    n_pad = _round_up(num_classes, _LANE)  # 128: lane-dense output

    # Glue (plain JAX): flatten like nn.Flatten(); keep everything f32 (no bf16 re-stream).
    x_flat = x_nchw.reshape(B, in_features).astype(jnp.float32)

    # Pad batch only to a sublane multiple (cheap), NOT to a tile multiple.
    b_pad = _round_up(B, _SUBLANE)
    if b_pad != B:
        x_flat = jnp.pad(x_flat, ((0, b_pad - B), (0, 0)))

    # Batch tile: large enough to amortize per-step overhead, but aim for >= 4 grid steps
    # so v7x's two TensorCores both get work. Always a multiple of 8 (f32 sublane).
    tb = min(block_b, max(_SUBLANE, _round_up(pl.cdiv(b_pad, 4), _SUBLANE)))
    tb = min(tb, b_pad)
    grid = pl.cdiv(b_pad, tb)  # ragged tail handled by Pallas (writes masked, rows independent)

    # VMEM budget: double-buffered x & out tiles + resident W/bias; 784 pads to 896 lanes.
    k_vmem = _round_up(in_features, _LANE)
    vmem_bytes = 4 * (2 * tb * k_vmem + 2 * tb * n_pad + 2 * k_vmem * n_pad + 2 * _SUBLANE * n_pad)
    vmem_limit = int(min(vmem_bytes + (8 << 20), 56 << 20))

    # Transpose W for x @ W^T; zero-pad classes; fold pad mask into an f32 bias row.
    w_p = jnp.pad(weight.T.astype(jnp.float32), ((0, 0), (0, n_pad - num_classes)))  # (784, 128)
    b_p = jnp.full((1, n_pad), _NEG_INF, dtype=jnp.float32)
    b_p = b_p.at[0, :num_classes].set(bias.astype(jnp.float32))

    out = pl.pallas_call(
        _classifier_kernel,
        out_shape=jax.ShapeDtypeStruct((b_pad, n_pad), jnp.float32),
        grid=(grid,),
        in_specs=[
            pl.BlockSpec((tb, in_features), lambda i: (i, 0)),     # streamed per batch tile
            pl.BlockSpec((in_features, n_pad), lambda i: (0, 0)),  # VMEM-resident
            pl.BlockSpec((1, n_pad), lambda i: (0, 0)),            # VMEM-resident
        ],
        out_specs=pl.BlockSpec((tb, n_pad), lambda i: (i, 0)),
        compiler_params=pltpu.CompilerParams(
            dimension_semantics=("parallel",),   # shard batch tiles across v7x's 2 TCs
            vmem_limit_bytes=vmem_limit,         # covers tb=2048 under v5e's 16 MiB default
        ),
    )(x_flat, w_p, b_p)

    return out[:B, :num_classes]


def init_params(key, in_features=28 * 28, num_classes=10):
    # Deterministic init mimicking PyTorch's default Linear init (uniform in +/- 1/sqrt(fan_in)).
    kw, kb = jax.random.split(key)
    bound = 1.0 / jnp.sqrt(jnp.float32(in_features))
    weight = jax.random.uniform(kw, (num_classes, in_features), jnp.float32, -bound, bound)
    bias = jax.random.uniform(kb, (num_classes,), jnp.float32, -bound, bound)
    return weight, bias


if __name__ == "__main__":
    key = jax.random.PRNGKey(0)
    k_x, k_p = jax.random.split(key)

    B = 2
    x = jax.random.normal(k_x, (B, 1, 28, 28), dtype=jnp.float32)  # NCHW, MNIST-like
    weight, bias = init_params(k_p)

    out = dummy_classifier_forward(x, weight, bias)
    out = jax.block_until_ready(out)

    # Sanity check against plain-JAX reference.
    x_flat = x.reshape(B, -1)
    logits_ref = x_flat @ weight.T + bias
    ref = jax.nn.log_softmax(logits_ref, axis=-1)
    assert out.shape == (B, 10)
    assert jnp.allclose(out, ref, atol=1e-5, rtol=1e-5)

    print("KERNEL_OK")
</pallas_src>

<mosaic_0001>
module attributes {stable_mosaic.version = 11 : i64} {
  func.func @_classifier_kernel(%arg0: i32, %arg1: memref<8x784xf32, #tpu.memory_space<vmem>>, %arg2: memref<784x128xf32, #tpu.memory_space<vmem>>, %arg3: memref<1x128xf32, #tpu.memory_space<vmem>>, %arg4: memref<8x128xf32, #tpu.memory_space<vmem>>) attributes {dimension_semantics = [#tpu.dimension_semantics<parallel>], iteration_bounds = array<i64: 1>, scalar_prefetch = 0 : i64, scratch_operands = 0 : i64, tpu.core_type = #tpu.core_type<tc>, window_params = [{transform_indices = @transform_0, window_bounds = array<i64: 8, 784>}, {pipeline_mode = #tpu.pipeline_mode<synchronous>, transform_indices = @transform_1, window_bounds = array<i64: 784, 128>}, {pipeline_mode = #tpu.pipeline_mode<synchronous>, transform_indices = @transform_2, window_bounds = array<i64: 1, 128>}, {transform_indices = @transform_3, window_bounds = array<i64: 8, 128>}]} {
    %c0 = arith.constant 0 : index
    %c0_0 = arith.constant 0 : index
    %0 = vector.load %arg1[%c0, %c0_0] : memref<8x784xf32, #tpu.memory_space<vmem>>, vector<8x784xf32>
    %c0_1 = arith.constant 0 : index
    %c0_2 = arith.constant 0 : index
    %1 = vector.load %arg2[%c0_1, %c0_2] : memref<784x128xf32, #tpu.memory_space<vmem>>, vector<784x128xf32>
    %cst = arith.constant dense<0.000000e+00> : vector<8x128xf32>
    %2 = tpu.matmul %0, %1, %cst {dimension_numbers = #tpu.dot_dimension_numbers<[1], [0], [0], [1], [0, 0, 1, 1], [], []>} : vector<8x784xf32>, vector<784x128xf32>, vector<8x128xf32> -> vector<8x128xf32>
    %c0_3 = arith.constant 0 : index
    %c0_4 = arith.constant 0 : index
    %3 = vector.load %arg3[%c0_3, %c0_4] : memref<1x128xf32, #tpu.memory_space<vmem>>, vector<1x128xf32>
    %4 = vector.broadcast %3 : vector<1x128xf32> to vector<8x128xf32>
    %5 = arith.addf %2, %4 : vector<8x128xf32>
    %cst_5 = arith.constant dense<0xFF800000> : vector<8xf32>
    %6 = vector.multi_reduction <maximumf>, %5, %cst_5 [1] : vector<8x128xf32> to vector<8xf32>
    %7 = vector.shape_cast %6 : vector<8xf32> to vector<8x1xf32>
    %8 = vector.broadcast %7 : vector<8x1xf32> to vector<8x128xf32>
    %9 = arith.subf %5, %8 : vector<8x128xf32>
    %10 = math.exp %9 : vector<8x128xf32>
    %cst_6 = arith.constant dense<0.000000e+00> : vector<8xf32>
    %11 = vector.multi_reduction <add>, %10, %cst_6 [1] : vector<8x128xf32> to vector<8xf32>
    %12 = vector.shape_cast %11 : vector<8xf32> to vector<8x1xf32>
    %13 = math.log %12 : vector<8x1xf32>
    %14 = vector.broadcast %13 : vector<8x1xf32> to vector<8x128xf32>
    %15 = arith.subf %9, %14 : vector<8x128xf32>
    %c0_7 = arith.constant 0 : index
    %c0_8 = arith.constant 0 : index
    %16 = vector.load %arg4[%c0_7, %c0_8] : memref<8x128xf32, #tpu.memory_space<vmem>>, vector<8x128xf32>
    tpu.vector_store %arg4[%c0_7, %c0_8], %15 {strides = array<i32>} : memref<8x128xf32, #tpu.memory_space<vmem>>, vector<8x128xf32>,
    return
  }
  func.func @transform_0(%arg0: i32) -> (i32, i32) {
    %c0_i32 = arith.constant 0 : i32
    %c0_i32_0 = arith.constant 0 : i32
    return %arg0, %c0_i32 : i32, i32
  }
  func.func @transform_1(%arg0: i32) -> (i32, i32) {
    %c0_i32 = arith.constant 0 : i32
    %c0_i32_0 = arith.constant 0 : i32
    %c0_i32_1 = arith.constant 0 : i32
    return %c0_i32, %c0_i32_0 : i32, i32
  }
  func.func @transform_2(%arg0: i32) -> (i32, i32) {
    %c0_i32 = arith.constant 0 : i32
    %c0_i32_0 = arith.constant 0 : i32
    %c0_i32_1 = arith.constant 0 : i32
    return %c0_i32, %c0_i32_0 : i32, i32
  }
  func.func @transform_3(%arg0: i32) -> (i32, i32) {
    %c0_i32 = arith.constant 0 : i32
    %c0_i32_0 = arith.constant 0 : i32
    return %arg0, %c0_i32 : i32, i32
  }
}

</mosaic_0001>

<bundles_post_ra>
// kernel: tpu_custom_call.1
= control target key start
LH: loop header
LB: loop body
LE: loop exit
PB: predicated region body
PF: predicated region fallthrough
CT: control target
= control target key end

     0   :  { %8 = vsyncpa [#allocation3], 0  ;;  %s453_s0 = inlined_call_operand.hbm [shape: f32[8,784], index: 0, kind: input, shape index: {}]   ;;  %s454_s1 = inlined_call_operand.hbm [shape: f32[784,128], index: 1, kind: input, shape index: {}]   ;;  %s455_s2 = inlined_call_operand.vmem [shape: f32[1,128], index: 2, kind: input, shape index: {}]   ;;  %s456_s3 = inlined_call_operand.hbm [shape: f32[8,128], index: 3, kind: output, shape index: {}]  }
   0x1   :  { %9 = vsyncpa [#allocation6], 0 }
   0x2   :  { %10 = vsyncpa [#allocation4], 0  ;;  %s16_s14 = sshll.u32 %s453_s0, 4  ;;  %s416_s15 = smov [#allocation2]   ;;  %s17_s14 = int_to_ptr.hbm [resolvable:$true] %s16_s14 }
   0x3   :  { %s18_s16 = sshll.u32 %s416_s15, 4  ;;  %s26_s19 = sshll.u32 %s454_s1, 4  ;;  %s19_s16 = int_to_ptr.vmem [resolvable:$true] %s18_s16  ;;  %s27_s19 = int_to_ptr.hbm [resolvable:$true] %s26_s19 }
   0x4   :  { %21 = dma.hbm_to_vmem [thread:$0]  %s17_s14, 896, %s19_s16, [#allocation3]  }
   0x5   :  { %s417_s20 = smov [#allocation5]   ;;  %s418_s22 = smov 128  }
   0x6   :  { %s28_s21 = sshll.u32 %s417_s20, 4  ;;  %s419_s23 = smov 8   ;;  %s29_s21 = int_to_ptr.vmem [resolvable:$true] %s28_s21 }
   0x7   :  { %34 = dma.hbm_to_vmem [thread:$0]  %s27_s19, 12544, %s29_s21, [#allocation6], %s418_s22, %s418_s22, %s419_s23  }
   0x8   :  { %410 = dma.done.wait [#allocation3], 896  }
   0x9   :  { %411 = vsyncadd [#allocation3], 4294966400 }
   0xa   :  { %412 = dma.done.wait [#allocation6], 12544  }
   0xb   :  { %413 = vsyncadd [#allocation6], 4294954752  ;;  %v67_v0 = vld [vmem:[#allocation5 + $0x78] sm:$0xff]  ;;  %v66_v1 = vld [vmem:[#allocation5 + $0x70] sm:$0xff]  ;;  %vm154_vm0 = vcmask 130048   ;;  %s316_s27 = sshll.u32 %s456_s3, 4  ;;  %s317_s27 = int_to_ptr.hbm [resolvable:$true] %s316_s27 }
   0xc   :  { %v83_v2 = vld [vmem:[#allocation5 + $0xf8] sm:$0xff]  ;;  %158 = vmatpush.msra.mxu0 %v67_v0  ;;  %v82_v3 = vld [vmem:[#allocation5 + $0xf0] sm:$0xff]  ;;  %v65_v4 = vld [vmem:[#allocation5 + $0x68] sm:$0xff] }
   0xd   :  { %178 = vmatpush.msra.mxu1 %v83_v2  ;;  %v81_v5 = vld [vmem:[#allocation5 + $0xe8] sm:$0xff]  ;;  %v64_v6 = vld [vmem:[#allocation5 + $0x60] sm:$0xff]  ;;  %v63_v8 = vld [vmem:[#allocation5 + $0x58] sm:$0xff] }
   0xe   :  { %159 = vmatpush.msra.mxu0 %v66_v1  ;;  %v80_v7 = vld [vmem:[#allocation5 + $0xe0] sm:$0xff]  ;;  %v79_v9 = vld [vmem:[#allocation5 + $0xd8] sm:$0xff]  ;;  %v62_v10 = vld [vmem:[#allocation5 + $0x50] sm:$0xff] }
   0xf   :  { %179 = vmatpush.msra.mxu1 %v82_v3  ;;  %v99_v11 = vld [vmem:[#allocation5 + $0x178] sm:$0xff]  ;;  %v78_v12 = vld [vmem:[#allocation5 + $0xd0] sm:$0xff]  ;;  %v97_v15 = vld [vmem:[#allocation5 + $0x168] sm:$0xff] }
  0x10   :  { %160 = vmatpush.msra.mxu0 %v65_v4  ;;  %198 = vmatpush.msra.mxu2 %v99_v11  ;;  %v98_v13 = vld [vmem:[#allocation5 + $0x170] sm:$0xff]  ;;  %v115_v14 = vld [vmem:[#allocation5 + $0x1f8] sm:$0xff]  ;;  %v61_v17 = vld [vmem:[#allocation5 + $0x48] sm:$0xff] }
  0x11   :  { %180 = vmatpush.msra.mxu1 %v81_v5  ;;  %v114_v16 = vld [vmem:[#allocation5 + $0x1f0] sm:$0xff]  ;;  %v77_v18 = vld [vmem:[#allocation5 + $0xc8] sm:$0xff]  ;;  %218 = vmatpush.msra.mxu3 %v115_v14  ;;  %v96_v19 = vld [vmem:[#allocation5 + $0x160] sm:$0xff] }
  0x12   :  { %161 = vmatpush.msra.mxu0 %v64_v6  ;;  %199 = vmatpush.msra.mxu2 %v98_v13  ;;  %v113_v20 = vld [vmem:[#allocation5 + $0x1e8] sm:$0xff]  ;;  %v60_v21 = vld [vmem:[#allocation5 + $0x40] sm:$0xff]  ;;  %v95_v23 = vld [vmem:[#allocation5 + $0x158] sm:$0xff] }
  0x13   :  { %181 = vmatpush.msra.mxu1 %v80_v7  ;;  %v76_v22 = vld [vmem:[#allocation5 + $0xc0] sm:$0xff]  ;;  %219 = vmatpush.msra.mxu3 %v114_v16  ;;  %v59_v25 = vld [vmem:[#allocation5 + $0x38] sm:$0xff]  ;;  %v94_v27 = vld [vmem:[#allocation5 + $0x150] sm:$0xff] }
  0x14   :  { %162 = vmatpush.msra.mxu0 %v63_v8  ;;  %200 = vmatpush.msra.mxu2 %v97_v15  ;;  %v112_v24 = vld [vmem:[#allocation5 + $0x1e0] sm:$0xff]  ;;  %v75_v26 = vld [vmem:[#allocation5 + $0xb8] sm:$0xff]  ;;  %v58_v29 = vld [vmem:[#allocation5 + $0x30] sm:$0xff] }
  0x15   :  { %182 = vmatpush.msra.mxu1 %v79_v9  ;;  %220 = vmatpush.msra.mxu3 %v113_v20  ;;  %v111_v28 = vld [vmem:[#allocation5 + $0x1d8] sm:$0xff]  ;;  %v74_v30 = vld [vmem:[#allocation5 + $0xb0] sm:$0xff]  ;;  %v93_v31 = vld [vmem:[#allocation5 + $0x148] sm:$0xff] }
  0x16   :  { %163 = vmatpush.msra.mxu0 %v62_v10  ;;  %201 = vmatpush.msra.mxu2 %v96_v19  ;;  %v110_v32 = vld [vmem:[#allocation5 + $0x1d0] sm:$0xff]  ;;  %v57_v33 = vld [vmem:[#allocation5 + $0x28] sm:$0xff]  ;;  %v92_v35 = vld [vmem:[#allocation5 + $0x140] sm:$0xff] }
  0x17   :  { %183 = vmatpush.msra.mxu1 %v78_v12  ;;  %221 = vmatpush.msra.mxu3 %v112_v24  ;;  %v73_v34 = vld [vmem:[#allocation5 + $0xa8] sm:$0xff]  ;;  %v56_v37 = vld [vmem:[#allocation5 + $0x20] sm:$0xff]  ;;  %v91_v39 = vld [vmem:[#allocation5 + $0x138] sm:$0xff] }
  0x18   :  { %164 = vmatpush.msra.mxu0 %v61_v17  ;;  %202 = vmatpush.msra.mxu2 %v95_v23  ;;  %v109_v36 = vld [vmem:[#allocation5 + $0x1c8] sm:$0xff]  ;;  %v72_v38 = vld [vmem:[#allocation5 + $0xa0] sm:$0xff]  ;;  %v55_v41 = vld [vmem:[#allocation5 + $0x18] sm:$0xff] }
  0x19   :  { %184 = vmatpush.msra.mxu1 %v77_v18  ;;  %222 = vmatpush.msra.mxu3 %v111_v28  ;;  %v108_v40 = vld [vmem:[#allocation5 + $0x1c0] sm:$0xff]  ;;  %v71_v42 = vld [vmem:[#allocation5 + $0x98] sm:$0xff]  ;;  %v90_v43 = vld [vmem:[#allocation5 + $0x130] sm:$0xff] }
  0x1a   :  { %165 = vmatpush.msra.mxu0 %v60_v21  ;;  %203 = vmatpush.msra.mxu2 %v94_v27  ;;  %v107_v44 = vld [vmem:[#allocation5 + $0x1b8] sm:$0xff]  ;;  %v54_v45 = vld [vmem:[#allocation5 + $0x10] sm:$0xff]  ;;  %v89_v47 = vld [vmem:[#allocation5 + $0x128] sm:$0xff] }
  0x1b   :  { %185 = vmatpush.msra.mxu1 %v76_v22  ;;  %223 = vmatpush.msra.mxu3 %v110_v32  ;;  %v70_v46 = vld [vmem:[#allocation5 + $0x90] sm:$0xff]  ;;  %v53_v49 = vld [vmem:[#allocation5 + $0x8] sm:$0xff]  ;;  %v88_v51 = vld [vmem:[#allocation5 + $0x120] sm:$0xff] }
  0x1c   :  { %166 = vmatpush.msra.mxu0 %v59_v25  ;;  %204 = vmatpush.msra.mxu2 %v93_v31  ;;  %v106_v48 = vld [vmem:[#allocation5 + $0x1b0] sm:$0xff]  ;;  %v69_v50 = vld [vmem:[#allocation5 + $0x88] sm:$0xff]  ;;  %v52_v53 = vld [vmem:[#allocation5] sm:$0xff] }
  0x1d   :  { %186 = vmatpush.msra.mxu1 %v75_v26  ;;  %224 = vmatpush.msra.mxu3 %v109_v36  ;;  %v105_v52 = vld [vmem:[#allocation5 + $0x1a8] sm:$0xff]  ;;  %v68_v54 = vld [vmem:[#allocation5 + $0x80] sm:$0xff]  ;;  %v131_v55 = vld [vmem:[#allocation5 + $0x278] sm:$0xff] }
  0x1e   :  { %167 = vmatpush.msra.mxu0 %v58_v29  ;;  %205 = vmatpush.msra.mxu2 %v92_v35  ;;  %v147_v56 = vld [vmem:[#allocation5 + $0x2f8] sm:$0xff]  ;;  %v104_v58 = vld [vmem:[#allocation5 + $0x1a0] sm:$0xff]  ;;  %v130_v59 = vld [vmem:[#allocation5 + $0x270] sm:$0xff] }
  0x1f   :  { %187 = vmatpush.msra.mxu1 %v74_v30  ;;  %225 = vmatpush.msra.mxu3 %v108_v40  ;;  %v87_v57 = vld [vmem:[#allocation5 + $0x118] sm:$0xff]  ;;  %v146_v60 = vld [vmem:[#allocation5 + $0x2f0] sm:$0xff]  ;;  %v129_v63 = vld [vmem:[#allocation5 + $0x268] sm:$0xff] }
  0x20   :  { %168 = vmatpush.msra.mxu0 %v57_v33  ;;  %206 = vmatpush.msra.mxu2 %v91_v39  ;;  %v86_v61 = vld [vmem:[#allocation5 + $0x110] sm:$0xff]  ;;  %v103_v62 = vld [vmem:[#allocation5 + $0x198] sm:$0xff]  ;;  %v145_v0 = vld [vmem:[#allocation5 + $0x2e8] sm:$0xff] }
  0x21   :  { %188 = vmatpush.msra.mxu1 %v73_v34  ;;  %226 = vmatpush.msra.mxu3 %v107_v44  ;;  %v85_v1 = vld [vmem:[#allocation5 + $0x108] sm:$0xff]  ;;  %v102_v2 = vld [vmem:[#allocation5 + $0x190] sm:$0xff]  ;;  %v128_v3 = vld [vmem:[#allocation5 + $0x260] sm:$0xff] }
  0x22   :  { %169 = vmatpush.msra.mxu0 %v56_v37  ;;  %207 = vmatpush.msra.mxu2 %v90_v43  ;;  %v144_v4 = vld [vmem:[#allocation5 + $0x2e0] sm:$0xff]  ;;  %v101_v6 = vld [vmem:[#allocation5 + $0x188] sm:$0xff]  ;;  %v127_v7 = vld [vmem:[#allocation5 + $0x258] sm:$0xff] }
  0x23   :  { %189 = vmatpush.msra.mxu1 %v72_v38  ;;  %227 = vmatpush.msra.mxu3 %v106_v48  ;;  %v84_v5 = vld [vmem:[#allocation5 + $0x100] sm:$0xff]  ;;  %v143_v8 = vld [vmem:[#allocation5 + $0x2d8] sm:$0xff]  ;;  %v126_v11 = vld [vmem:[#allocation5 + $0x250] sm:$0xff] }
  0x24   :  { %170 = vmatpush.msra.mxu0 %v55_v41  ;;  %208 = vmatpush.msra.mxu2 %v89_v47  ;;  %v47_v9 = vld [vmem:[#allocation2 + $0x10] sm:$0xff]  ;;  %v100_v10 = vld [vmem:[#allocation5 + $0x180] sm:$0xff]  ;;  %v142_v12 = vld [vmem:[#allocation5 + $0x2d0] sm:$0xff] }
  0x25   :  { %190 = vmatpush.msra.mxu1 %v71_v42  ;;  %228 = vmatpush.msra.mxu3 %v105_v52  ;;  %v149_v13 = vld [vmem:[#allocation5 + $0x308] sm:$0xff]  ;;  %v48_v17 = vld [vmem:[#allocation2 + $0x18] sm:$0xff]  ;;  %v46_v18 = vld [vmem:[#allocation2 + $0x8] sm:$0xff] }
  0x26   :  { %171 = vmatpush.msra.mxu0 %v54_v45  ;;  %209 = vmatpush.msra.mxu2 %v88_v51  ;;  %v45_v14 = vld [vmem:[#allocation2] sm:$0xff]  ;;  %v124_v19 = vld [vmem:[#allocation5 + $0x240] sm:$0xff]  ;;  %v123_v22 = vld [vmem:[#allocation5 + $0x238] sm:$0xff] }
  0x27   :  { %191 = vmatpush.msra.mxu1 %v70_v46  ;;  %229 = vmatpush.msra.mxu3 %v104_v58  ;;  %v125_v15 = vld [vmem:[#allocation5 + $0x248] sm:$0xff]  ;;  %v140_v20 = vld [vmem:[#allocation5 + $0x2c0] sm:$0xff]  ;;  %v139_v23 = vld [vmem:[#allocation5 + $0x2b8] sm:$0xff] }
  0x28   :  { %172 = vmatpush.msra.mxu0 %v53_v49  ;;  %210 = vmatpush.msra.mxu2 %v87_v57  ;;  %v141_v16 = vld [vmem:[#allocation5 + $0x2c8] sm:$0xff]  ;;  %v148_v21 = vld [vmem:[#allocation5 + $0x300] sm:$0xff]  ;;  %v51_v24 = vld [vmem:[#allocation2 + $0x30] sm:$0xff] }
  0x29   :  { %192 = vmatpush.msra.mxu1 %v69_v50  ;;  %230 = vmatpush.msra.mxu3 %v103_v62  ;;  %v122_v25 = vld [vmem:[#allocation5 + $0x230] sm:$0xff]  ;;  %v121_v27 = vld [vmem:[#allocation5 + $0x228] sm:$0xff]  ;;  %v120_v29 = vld [vmem:[#allocation5 + $0x220] sm:$0xff] }
  0x2a   :  { %173 = vmatpush.msra.mxu0 %v52_v53  ;;  %211 = vmatpush.msra.mxu2 %v86_v61  ;;  %v138_v26 = vld [vmem:[#allocation5 + $0x2b0] sm:$0xff]  ;;  %v137_v28 = vld [vmem:[#allocation5 + $0x2a8] sm:$0xff]  ;;  %v136_v30 = vld [vmem:[#allocation5 + $0x2a0] sm:$0xff] }
  0x2b   :  { %193 = vmatpush.msra.mxu1 %v68_v54  ;;  %231 = vmatpush.msra.mxu3 %v102_v2  ;;  %v119_v31 = vld [vmem:[#allocation5 + $0x218] sm:$0xff]  ;;  %v118_v33 = vld [vmem:[#allocation5 + $0x210] sm:$0xff]  ;;  %v117_v35 = vld [vmem:[#allocation5 + $0x208] sm:$0xff] }
  0x2c   :  { %238 = vmatpush.msrb.mxu0 %v131_v55  ;;  %212 = vmatpush.msra.mxu2 %v85_v1  ;;  %v135_v32 = vld [vmem:[#allocation5 + $0x298] sm:$0xff]  ;;  %v134_v34 = vld [vmem:[#allocation5 + $0x290] sm:$0xff]  ;;  %v133_v36 = vld [vmem:[#allocation5 + $0x288] sm:$0xff] }
  0x2d   :  { %258 = vmatpush.msrb.mxu1 %v147_v56  ;;  %232 = vmatpush.msra.mxu3 %v101_v6  ;;  %v116_v37 = vld [vmem:[#allocation5 + $0x200] sm:$0xff]  ;;  %v49_v39 = vld [vmem:[#allocation2 + $0x20] sm:$0xff]  ;;  %v50_v40 = vld [vmem:[#allocation2 + $0x28] sm:$0xff] }
  0x2e   :  { %239 = vmatpush.msrb.mxu0 %v130_v59  ;;  %213 = vmatpush.msra.mxu2 %v84_v5  ;;  %v132_v38 = vld [vmem:[#allocation5 + $0x280] sm:$0xff]  ;;  %v333_v41 = vld [vmem:[%s455_s2] ss:$0 sm:$0xff]  ;;  %s420_s2 = smov [#allocation7]  }
  0x2f   :  { %259 = vmatpush.msrb.mxu1 %v146_v60  ;;  %214 = vmatmul.f32.vlgmr.msra.gmra.mxu2 %v47_v9  ;;  %s314_s24 = sshll.u32 %s420_s2, 4  ;;  %s315_s24 = int_to_ptr.vmem [resolvable:$true] %s314_s24 }
  0x30   :  { %240 = vmatpush.msrb.mxu0 %v129_v63  ;;  %233 = vmatpush.msra.mxu3 %v100_v10 }
  0x31   :  { %260 = vmatpush.msrb.mxu1 %v145_v0  ;;  %292 = vmatpush.msrb.mxu2 %v149_v13 }
  0x32   :  { %241 = vmatpush.msrb.mxu0 %v128_v3  ;;  %234 = vmatmul.f32.vlgmr.msra.gmra.mxu3 %v48_v17 }
  0x33   :  { %261 = vmatpush.msrb.mxu1 %v144_v4  ;;  %174 = vmatmul.f32.vlgmr.msra.gmra.mxu0 %v45_v14 }
  0x34   :  { %242 = vmatpush.msrb.mxu0 %v127_v7  ;;  %194 = vmatmul.f32.vlgmr.msra.gmra.mxu1 %v46_v18 }
  0x35   :  { %262 = vmatpush.msrb.mxu1 %v143_v8  ;;  %293 = vmatpush.msrb.mxu2 %v148_v21 }
  0x36   :  { %243 = vmatpush.msrb.mxu0 %v126_v11 }
  0x37   :  { %263 = vmatpush.msrb.mxu1 %v142_v12  ;;  %327 = vmatmul.msk.f32.vlgmr.msrb.gmra.mxu2 %vm154_vm0, %v51_v24 }
  0x38   :  { %244 = vmatpush.msrb.mxu0 %v125_v15 }
  0x39   :  { %264 = vmatpush.msrb.mxu1 %v141_v16 }
  0x3a   :  { %245 = vmatpush.msrb.mxu0 %v124_v19 }
  0x3b   :  { %265 = vmatpush.msrb.mxu1 %v140_v20 }
  0x3c   :  { %246 = vmatpush.msrb.mxu0 %v123_v22 }
  0x3d   :  { %266 = vmatpush.msrb.mxu1 %v139_v23 }
  0x3e   :  { %247 = vmatpush.msrb.mxu0 %v122_v25 }
  0x3f   :  { %267 = vmatpush.msrb.mxu1 %v138_v26 }
  0x40   :  { %248 = vmatpush.msrb.mxu0 %v121_v27 }
  0x41   :  { %268 = vmatpush.msrb.mxu1 %v137_v28 }
  0x42   :  { %249 = vmatpush.msrb.mxu0 %v120_v29 }
  0x43   :  { %269 = vmatpush.msrb.mxu1 %v136_v30 }
  0x44   :  { %250 = vmatpush.msrb.mxu0 %v119_v31 }
  0x45   :  { %270 = vmatpush.msrb.mxu1 %v135_v32 }
  0x46   :  { %251 = vmatpush.msrb.mxu0 %v118_v33 }
  0x47   :  { %271 = vmatpush.msrb.mxu1 %v134_v34 }
  0x48   :  { %252 = vmatpush.msrb.mxu0 %v117_v35 }
  0x49   :  { %272 = vmatpush.msrb.mxu1 %v133_v36 }
  0x4a   :  { %253 = vmatpush.msrb.mxu0 %v116_v37 }
  0x4b   :  { %273 = vmatpush.msrb.mxu1 %v132_v38  ;;  %254 = vmatmul.f32.vlgmr.msrb.gmra.mxu0 %v49_v39 }
  0x4c   :  { %274 = vmatmul.f32.vlgmr.msrb.gmra.mxu1 %v50_v40 }
  0xb0   :  { %v175_v42 = vpop.f32.mrf.mxu0 }
  0xb1   :  { %v176_v43 = vadd.f32 %v333_v41, %v175_v42  ;;  %v195_v44 = vpop.f32.mrf.mxu1 }
  0xb2   :  { %v215_v46 = vpop.f32.mrf.mxu2 }
  0xb3   :  { %v196_v45 = vadd.f32 %v195_v44, %v176_v43 }
  0xb5   :  { %v216_v47 = vadd.f32 %v215_v46, %v196_v45  ;;  %v235_v48 = vpop.f32.mrf.mxu3 }
  0xb7   :  { %v236_v49 = vadd.f32 %v235_v48, %v216_v47 }
  0xba   :  { %v295_v53 = vpop.f32.mrf.mxu2 }
  0xc8   :  { %v255_v50 = vpop.f32.mrf.mxu0 }
  0xc9   :  { %v275_v51 = vpop.f32.mrf.mxu1  ;;  %v256_v52 = vadd.f32 %v255_v50, %v236_v49 }
  0xcb   :  { %v276_v54 = vadd.f32 %v275_v51, %v256_v52 }
  0xcd   :  { %v296_v55 = vadd.f32 %v295_v53, %v276_v54 }
  0xcf   :  { %298 = vmax.xlane.f32.xlu0 %v296_v55 }
 0x142   :  { %v299_v56 = vpop.xlane.xlu0 %298 }
 0x143   :  { %v300_v57 = vsub.f32 %v296_v55, %v299_v56 }
 0x145   :  { %v301_v58 = vmul.f32 1.442695, %v300_v57 }
 0x147   :  { %334 = vpow2.f32 %v301_v58 }
 0x14d   :  { %v335_v59 = vpop.eup %334 }
 0x14e   :  { %303 = vadd.xlane.f32.xlu0 %v335_v59 }
 0x1c1   :  { %v304_v60 = vpop.xlane.xlu0 %303 }
 0x1c2   :  { %336 = vlog2.f32 %v304_v60 }
 0x1c8   :  { %v337_v61 = vpop.eup %336 }
 0x1c9   :  { %v306_v62 = vmul.f32 0.6931472, %v337_v61 }
 0x1cb   :  { %v307_v63 = vsub.f32 %v300_v57, %v306_v62 }
 0x1cd   :  { %308 = vst [vmem:[#allocation7] sm:$0xff] %v307_v63 }
 0x1ce   :  { %319 = dma.vmem_to_hbm [thread:$0]  %s315_s24, 128, %s317_s27, [#allocation4]  }
 0x1cf   :  { %414 = dma.done.wait [#allocation4], 128  }
 0x1d0   :  { %415 = vsyncadd [#allocation4], 4294967168 }
 0x1d1   :  { %324 = vsyncpa [#allocation3], 1 }
 0x1d2   :  { %325 = vsyncpa [#allocation6], 1 }
 0x1d3   :  { %326 = vsyncpa [#allocation4], 1 }

</bundles_post_ra>
